<compile_context>
chip_gen: v7x
topology: tpu7x:2x2x1
jax: 0.10.0
libtpu: 0.0.40
codegen_flags: <defaults>
</compile_context>

<pallas_src>
import jax
import jax.numpy as jnp
from jax.experimental import pallas as pl
from jax.experimental.pallas import tpu as pltpu


def _round_up(x, m):
    return ((x + m - 1) // m) * m


# ---------------------------------------------------------------------------
# Kernel A: GCN feature transform (the nn.Linear of both GCNs, both views)
#   xw_a = [s1 @ W1 | s2 @ W1]   (Np, 2Hp)   -> feeds the `adj` propagation
#   xw_d = [s1 @ W2 | s2 @ W2]   (Np, 2Hp)   -> feeds the `diff` propagation
# ---------------------------------------------------------------------------
def feat_kernel(s1_ref, s2_ref, w1_ref, w2_ref, xwa_ref, xwd_ref):
    hp = w1_ref.shape[1]
    s1 = s1_ref[...]
    s2 = s2_ref[...]
    w1 = w1_ref[...]
    w2 = w2_ref[...]
    dt = xwa_ref.dtype
    # Write each half straight into the output lane slice (no concat copies).
    xwa_ref[:, :hp] = jnp.dot(s1, w1, preferred_element_type=jnp.float32).astype(dt)
    xwa_ref[:, hp:] = jnp.dot(s2, w1, preferred_element_type=jnp.float32).astype(dt)
    xwd_ref[:, :hp] = jnp.dot(s1, w2, preferred_element_type=jnp.float32).astype(dt)
    xwd_ref[:, hp:] = jnp.dot(s2, w2, preferred_element_type=jnp.float32).astype(dt)


# ---------------------------------------------------------------------------
# Kernel B: propagation  ha = PReLU(adj @ xw_a + b1) = [h1 | h3]
#                        hd = PReLU(diff @ xw_d + b2) = [h2 | h4]
# Grid = (rows "parallel", k-reduction "arbitrary" last); f32 VMEM accumulators.
# ---------------------------------------------------------------------------
def prop_kernel(alphas_ref, adj_ref, diff_ref, xwa_ref, xwd_ref, ba_ref, bd_ref,
                ha_ref, hd_ref, acc_a, acc_d):
    k = pl.program_id(1)

    @pl.when(k == 0)
    def _():
        acc_a[...] = jnp.zeros_like(acc_a)
        acc_d[...] = jnp.zeros_like(acc_d)

    acc_a[...] += jnp.dot(adj_ref[...], xwa_ref[...],
                          preferred_element_type=jnp.float32)
    acc_d[...] += jnp.dot(diff_ref[...], xwd_ref[...],
                          preferred_element_type=jnp.float32)

    @pl.when(k == pl.num_programs(1) - 1)
    def _():
        a1 = alphas_ref[0]                      # PReLU slopes from SMEM
        a2 = alphas_ref[1]
        ha = acc_a[...] + ba_ref[...]           # bias concat was hoisted outside
        ha_ref[...] = jnp.where(ha >= 0.0, ha, a1 * ha)
        hd = acc_d[...] + bd_ref[...]
        hd_ref[...] = jnp.where(hd >= 0.0, hd, a2 * hd)


# ---------------------------------------------------------------------------
# Kernel C: bilinear discriminator, lane-dense.
#   score(h, c) = <h, c @ W^T> + b ; u1/u2 are folded into the (2Hp,128)
#   matrices Ua/Ud so the 4 cross-lane reductions become MXU matmuls and the
#   store is a full 128-lane unmasked slab.  cols 0..3 = sc1..sc4.
# ---------------------------------------------------------------------------
def disc_kernel(bb_ref, ha_ref, hd_ref, ua_ref, ud_ref, out_ref):
    acc = jnp.dot(ha_ref[...], ua_ref[...], preferred_element_type=jnp.float32)
    acc = acc + jnp.dot(hd_ref[...], ud_ref[...], preferred_element_type=jnp.float32)
    out_ref[...] = acc + bb_ref[0]


# ------------------------------ Model glue -----------------------------------
def model_forward(params, seq1, seq2, adj, diff, *,
                  mxu_dtype=jnp.bfloat16, tile=512):
    # seq*: (1, N, n_in); adj/diff: (1, N, N) -> squeeze batch for 2-D kernels
    s1, s2 = seq1[0], seq2[0]
    A, D = adj[0], diff[0]
    N, n_in = s1.shape
    H = params["w1"].shape[1]

    f32 = jnp.float32
    # ---- padded / tiled sizes (zero padding is exact) -----------------------
    Hp = _round_up(H, 128)                       # lane-aligned hidden dim
    T = _round_up(N, 8) if N <= tile else tile   # row tile == k tile
    Np = _round_up(N, T)
    grid_m = Np // T
    grid_k = Np // T

    # ---- pad & (optionally) downcast once, outside the hot loop -------------
    s1_p = jnp.zeros((Np, n_in), f32).at[:N].set(s1)
    s2_p = jnp.zeros((Np, n_in), f32).at[:N].set(s2)
    # NOTE: in a training loop adj/diff are constant -> pre-cast them once to
    # mxu_dtype outside the step to avoid repeating this cast per forward.
    A_p = jnp.zeros((Np, Np), mxu_dtype).at[:N, :N].set(A.astype(mxu_dtype))
    D_p = jnp.zeros((Np, Np), mxu_dtype).at[:N, :N].set(D.astype(mxu_dtype))
    w1_p = jnp.zeros((n_in, Hp), f32).at[:, :H].set(params["w1"])
    w2_p = jnp.zeros((n_in, Hp), f32).at[:, :H].set(params["w2"])
    b1_p = jnp.zeros((1, Hp), f32).at[:, :H].set(params["b1"])
    b2_p = jnp.zeros((1, Hp), f32).at[:, :H].set(params["b2"])
    ba = jnp.concatenate([b1_p, b1_p], axis=1)          # (1, 2Hp), hoisted
    bd = jnp.concatenate([b2_p, b2_p], axis=1)
    alphas = jnp.concatenate([params["a1"].reshape(-1),
                              params["a2"].reshape(-1)])  # (2,) SMEM scalars

    smem = pl.BlockSpec(memory_space=pltpu.MemorySpace.SMEM)

    # ---------------- Kernel A: feature transform ----------------------------
    xw_a, xw_d = pl.pallas_call(
        feat_kernel,
        out_shape=(jax.ShapeDtypeStruct((Np, 2 * Hp), mxu_dtype),
                   jax.ShapeDtypeStruct((Np, 2 * Hp), mxu_dtype)),
        grid=(grid_m,),
        in_specs=[
            pl.BlockSpec((T, n_in), lambda i: (i, 0)),
            pl.BlockSpec((T, n_in), lambda i: (i, 0)),
            pl.BlockSpec((n_in, Hp), lambda i: (0, 0)),
            pl.BlockSpec((n_in, Hp), lambda i: (0, 0)),
        ],
        out_specs=(pl.BlockSpec((T, 2 * Hp), lambda i: (i, 0)),
                   pl.BlockSpec((T, 2 * Hp), lambda i: (i, 0))),
        compiler_params=pltpu.CompilerParams(
            dimension_semantics=("parallel",)),
    )(s1_p, s2_p, w1_p, w2_p)

    # ---------------- Kernel B: row-tiled propagation ------------------------
    itm = jnp.dtype(mxu_dtype).itemsize
    cost = pl.CostEstimate(
        flops=int(8 * Np * Np * Hp),                 # two (Np,Np)@(Np,2Hp) matmuls
        transcendentals=0,
        bytes_accessed=int(2 * Np * Np * itm          # adj + diff
                           + 2 * Np * 2 * Hp * itm    # xw_a + xw_d
                           + 2 * Np * 2 * Hp * 4),    # ha + hd
    )
    ha, hd = pl.pallas_call(
        prop_kernel,
        out_shape=(jax.ShapeDtypeStruct((Np, 2 * Hp), f32),
                   jax.ShapeDtypeStruct((Np, 2 * Hp), f32)),
        grid=(grid_m, grid_k),
        in_specs=[
            smem,                                                # PReLU alphas
            pl.BlockSpec((T, T), lambda i, k: (i, k)),           # adj tile
            pl.BlockSpec((T, T), lambda i, k: (i, k)),           # diff tile
            pl.BlockSpec((T, 2 * Hp), lambda i, k: (k, 0)),      # xw_a k-tile
            pl.BlockSpec((T, 2 * Hp), lambda i, k: (k, 0)),      # xw_d k-tile
            pl.BlockSpec((1, 2 * Hp), lambda i, k: (0, 0)),      # bias a
            pl.BlockSpec((1, 2 * Hp), lambda i, k: (0, 0)),      # bias d
        ],
        out_specs=(pl.BlockSpec((T, 2 * Hp), lambda i, k: (i, 0)),
                   pl.BlockSpec((T, 2 * Hp), lambda i, k: (i, 0))),
        scratch_shapes=[pltpu.VMEM((T, 2 * Hp), f32),
                        pltpu.VMEM((T, 2 * Hp), f32)],
        compiler_params=pltpu.CompilerParams(
            dimension_semantics=("parallel", "arbitrary")),
        cost_estimate=cost,
    )(alphas, A_p, D_p, xw_a, xw_d, ba, bd)

    # ---------------- Readout + sigmoid + c@W^T (O(N*H), plain XLA) ----------
    h1 = ha[:N, :H]
    h2 = hd[:N, :H]
    c1 = jax.nn.sigmoid(jnp.mean(h1, axis=0))
    c2 = jax.nn.sigmoid(jnp.mean(h2, axis=0))
    u = jnp.stack([c1, c2], axis=0) @ params["w_bil_t"]      # (2, H)
    u1, u2 = u[0], u[1]

    PC = 128                                                  # lane-dense slab
    Ud = jnp.zeros((2 * Hp, PC), f32)
    Ud = Ud.at[:H, 0].set(u1).at[Hp:Hp + H, 2].set(u1)        # sc1(h2), sc3(h4)
    Ua = jnp.zeros((2 * Hp, PC), f32)
    Ua = Ua.at[:H, 1].set(u2).at[Hp:Hp + H, 3].set(u2)        # sc2(h1), sc4(h3)
    bb = params["b_bil"].reshape(-1)                          # (1,)

    # ---------------- Kernel C: lane-dense discriminator ---------------------
    scores = pl.pallas_call(
        disc_kernel,
        out_shape=jax.ShapeDtypeStruct((Np, PC), f32),
        grid=(grid_m,),
        in_specs=[
            smem,                                             # bilinear bias
            pl.BlockSpec((T, 2 * Hp), lambda i: (i, 0)),      # ha = [h1|h3]
            pl.BlockSpec((T, 2 * Hp), lambda i: (i, 0)),      # hd = [h2|h4]
            pl.BlockSpec((2 * Hp, PC), lambda i: (0, 0)),     # Ua
            pl.BlockSpec((2 * Hp, PC), lambda i: (0, 0)),     # Ud
        ],
        out_specs=pl.BlockSpec((T, PC), lambda i: (i, 0)),
        compiler_params=pltpu.CompilerParams(
            dimension_semantics=("parallel",)),
    )(bb, ha, hd, Ua, Ud)

    # torch.cat((sc_1, sc_2, sc_3, sc_4), dim=1) -> (1, 4N)
    logits = scores[:N, :4].T.reshape(1, 4 * N)
    return logits, h1[None], h2[None]


# ----------------------- pure-JAX reference (for check) ----------------------
def reference_forward(params, seq1, seq2, adj, diff):
    def gcn_ref(s, w, A, b, a):
        out = A @ (s @ w) + b
        return jnp.where(out >= 0.0, out, a[0, 0] * out)

    s1, s2 = seq1[0], seq2[0]
    A, D = adj[0], diff[0]
    h1 = gcn_ref(s1, params["w1"], A, params["b1"], params["a1"])
    h2 = gcn_ref(s1, params["w2"], D, params["b2"], params["a2"])
    h3 = gcn_ref(s2, params["w1"], A, params["b1"], params["a1"])
    h4 = gcn_ref(s2, params["w2"], D, params["b2"], params["a2"])
    c1 = jax.nn.sigmoid(jnp.mean(h1, axis=0, keepdims=True))
    c2 = jax.nn.sigmoid(jnp.mean(h2, axis=0, keepdims=True))
    W, b = params["w_bil"], params["b_bil"][0, 0]

    def score(h, c):
        return jnp.sum((h @ W) * c, axis=-1) + b

    logits = jnp.concatenate(
        [score(h2, c1), score(h1, c2), score(h4, c1), score(h3, c2)], axis=0
    ).reshape(1, -1)
    return logits, h1[None], h2[None]


# ------------------------------ param init -----------------------------------
def xavier_uniform(key, shape, fan_in, fan_out):
    bound = (6.0 / (fan_in + fan_out)) ** 0.5
    return jax.random.uniform(key, shape, jnp.float32, -bound, bound)


def init_params(key, n_in, n_h):
    k1, k2, k3 = jax.random.split(key, 3)
    # torch xavier_uniform_ on the (1, n_h, n_h) Bilinear weight:
    # fan_in = n_h*n_h, fan_out = 1*n_h
    w_bil = xavier_uniform(k3, (n_h, n_h), fan_in=n_h * n_h, fan_out=n_h)
    return {
        # GCN Linear weights, stored transposed: (n_in, n_h)
        "w1": xavier_uniform(k1, (n_in, n_h), fan_in=n_in, fan_out=n_h),
        "w2": xavier_uniform(k2, (n_in, n_h), fan_in=n_in, fan_out=n_h),
        "b1": jnp.zeros((1, n_h), jnp.float32),
        "b2": jnp.zeros((1, n_h), jnp.float32),
        # PReLU default init: alpha = 0.25
        "a1": jnp.full((1, 1), 0.25, jnp.float32),
        "a2": jnp.full((1, 1), 0.25, jnp.float32),
        "w_bil": w_bil,
        "w_bil_t": w_bil.T,               # hoisted transpose (used by the kernel path)
        "b_bil": jnp.zeros((1, 1), jnp.float32),
    }


if __name__ == "__main__":
    B, N, n_in, n_h = 1, 8, 16, 32

    key = jax.random.PRNGKey(0)
    kp, ks1, ks2, ka, kd = jax.random.split(key, 5)

    params = init_params(kp, n_in, n_h)
    seq1 = jax.random.normal(ks1, (B, N, n_in), jnp.float32)
    seq2 = jax.random.normal(ks2, (B, N, n_in), jnp.float32)
    adj = jax.random.uniform(ka, (B, N, N), jnp.float32)
    diff = jax.random.uniform(kd, (B, N, N), jnp.float32)
    # row-normalize like a typical propagation matrix
    adj = adj / jnp.sum(adj, axis=-1, keepdims=True)
    diff = diff / jnp.sum(diff, axis=-1, keepdims=True)

    fwd = jax.jit(model_forward, static_argnames=("mxu_dtype", "tile"))

    ref_logits, ref_h1, ref_h2 = reference_forward(params, seq1, seq2, adj, diff)

    # ---- default fast path: bf16 MXU operands for the N^2 propagation -------
    logits, h1, h2 = fwd(params, seq1, seq2, adj, diff)
    jax.block_until_ready((logits, h1, h2))
    assert logits.shape == (B, 4 * N)
    assert h1.shape == (B, N, n_h) and h2.shape == (B, N, n_h)
    assert jnp.allclose(logits, ref_logits, rtol=3e-2, atol=3e-2)
    assert jnp.allclose(h1, ref_h1, rtol=3e-2, atol=3e-2)
    assert jnp.allclose(h2, ref_h2, rtol=3e-2, atol=3e-2)

    # ---- f32 path: tight correctness check of the kernel structure ----------
    logits32, h1_32, h2_32 = fwd(params, seq1, seq2, adj, diff,
                                 mxu_dtype=jnp.float32)
    jax.block_until_ready((logits32, h1_32, h2_32))
    assert jnp.allclose(logits32, ref_logits, rtol=1e-4, atol=1e-4)
    assert jnp.allclose(h1_32, ref_h1, rtol=1e-4, atol=1e-4)
    assert jnp.allclose(h2_32, ref_h2, rtol=1e-4, atol=1e-4)

    print("KERNEL_OK")
</pallas_src>

<mosaic_0001>
module attributes {stable_mosaic.version = 11 : i64} {
  func.func @feat_kernel(%arg0: i32, %arg1: memref<8x16xf32, #tpu.memory_space<vmem>>, %arg2: memref<8x16xf32, #tpu.memory_space<vmem>>, %arg3: memref<16x128xf32, #tpu.memory_space<vmem>>, %arg4: memref<16x128xf32, #tpu.memory_space<vmem>>, %arg5: memref<8x256xbf16, #tpu.memory_space<vmem>>, %arg6: memref<8x256xbf16, #tpu.memory_space<vmem>>) attributes {dimension_semantics = [#tpu.dimension_semantics<parallel>], iteration_bounds = array<i64: 1>, scalar_prefetch = 0 : i64, scratch_operands = 0 : i64, tpu.core_type = #tpu.core_type<tc>, window_params = [{transform_indices = @transform_0, window_bounds = array<i64: 8, 16>}, {transform_indices = @transform_1, window_bounds = array<i64: 8, 16>}, {pipeline_mode = #tpu.pipeline_mode<synchronous>, transform_indices = @transform_2, window_bounds = array<i64: 16, 128>}, {pipeline_mode = #tpu.pipeline_mode<synchronous>, transform_indices = @transform_3, window_bounds = array<i64: 16, 128>}, {transform_indices = @transform_4, window_bounds = array<i64: 8, 256>}, {transform_indices = @transform_5, window_bounds = array<i64: 8, 256>}]} {
    %c0 = arith.constant 0 : index
    %c0_0 = arith.constant 0 : index
    %0 = vector.load %arg1[%c0, %c0_0] : memref<8x16xf32, #tpu.memory_space<vmem>>, vector<8x16xf32>
    %c0_1 = arith.constant 0 : index
    %c0_2 = arith.constant 0 : index
    %1 = vector.load %arg2[%c0_1, %c0_2] : memref<8x16xf32, #tpu.memory_space<vmem>>, vector<8x16xf32>
    %c0_3 = arith.constant 0 : index
    %c0_4 = arith.constant 0 : index
    %2 = vector.load %arg3[%c0_3, %c0_4] : memref<16x128xf32, #tpu.memory_space<vmem>>, vector<16x128xf32>
    %c0_5 = arith.constant 0 : index
    %c0_6 = arith.constant 0 : index
    %3 = vector.load %arg4[%c0_5, %c0_6] : memref<16x128xf32, #tpu.memory_space<vmem>>, vector<16x128xf32>
    %cst = arith.constant dense<0.000000e+00> : vector<8x128xf32>
    %4 = tpu.matmul %0, %2, %cst {dimension_numbers = #tpu.dot_dimension_numbers<[1], [0], [0], [1], [0, 0, 1, 1], [], []>} : vector<8x16xf32>, vector<16x128xf32>, vector<8x128xf32> -> vector<8x128xf32>
    %5 = arith.truncf %4 : vector<8x128xf32> to vector<8x128xbf16>
    %c0_7 = arith.constant 0 : index
    %c0_8 = arith.constant 0 : index
    %6 = vector.load %arg5[%c0_7, %c0_8] : memref<8x256xbf16, #tpu.memory_space<vmem>>, vector<8x128xbf16>
    tpu.vector_store %arg5[%c0_7, %c0_8], %5 {strides = array<i32>} : memref<8x256xbf16, #tpu.memory_space<vmem>>, vector<8x128xbf16>,
    %cst_9 = arith.constant dense<0.000000e+00> : vector<8x128xf32>
    %7 = tpu.matmul %1, %2, %cst_9 {dimension_numbers = #tpu.dot_dimension_numbers<[1], [0], [0], [1], [0, 0, 1, 1], [], []>} : vector<8x16xf32>, vector<16x128xf32>, vector<8x128xf32> -> vector<8x128xf32>
    %8 = arith.truncf %7 : vector<8x128xf32> to vector<8x128xbf16>
    %c0_10 = arith.constant 0 : index
    %c128 = arith.constant 128 : index
    %9 = vector.load %arg5[%c0_10, %c128] : memref<8x256xbf16, #tpu.memory_space<vmem>>, vector<8x128xbf16>
    tpu.vector_store %arg5[%c0_10, %c128], %8 {strides = array<i32>} : memref<8x256xbf16, #tpu.memory_space<vmem>>, vector<8x128xbf16>,
    %cst_11 = arith.constant dense<0.000000e+00> : vector<8x128xf32>
    %10 = tpu.matmul %0, %3, %cst_11 {dimension_numbers = #tpu.dot_dimension_numbers<[1], [0], [0], [1], [0, 0, 1, 1], [], []>} : vector<8x16xf32>, vector<16x128xf32>, vector<8x128xf32> -> vector<8x128xf32>
    %11 = arith.truncf %10 : vector<8x128xf32> to vector<8x128xbf16>
    %c0_12 = arith.constant 0 : index
    %c0_13 = arith.constant 0 : index
    %12 = vector.load %arg6[%c0_12, %c0_13] : memref<8x256xbf16, #tpu.memory_space<vmem>>, vector<8x128xbf16>
    tpu.vector_store %arg6[%c0_12, %c0_13], %11 {strides = array<i32>} : memref<8x256xbf16, #tpu.memory_space<vmem>>, vector<8x128xbf16>,
    %cst_14 = arith.constant dense<0.000000e+00> : vector<8x128xf32>
    %13 = tpu.matmul %1, %3, %cst_14 {dimension_numbers = #tpu.dot_dimension_numbers<[1], [0], [0], [1], [0, 0, 1, 1], [], []>} : vector<8x16xf32>, vector<16x128xf32>, vector<8x128xf32> -> vector<8x128xf32>
    %14 = arith.truncf %13 : vector<8x128xf32> to vector<8x128xbf16>
    %c0_15 = arith.constant 0 : index
    %c128_16 = arith.constant 128 : index
    %15 = vector.load %arg6[%c0_15, %c128_16] : memref<8x256xbf16, #tpu.memory_space<vmem>>, vector<8x128xbf16>
    tpu.vector_store %arg6[%c0_15, %c128_16], %14 {strides = array<i32>} : memref<8x256xbf16, #tpu.memory_space<vmem>>, vector<8x128xbf16>,
    return
  }
  func.func @transform_0(%arg0: i32) -> (i32, i32) {
    %c0_i32 = arith.constant 0 : i32
    %c0_i32_0 = arith.constant 0 : i32
    return %arg0, %c0_i32 : i32, i32
  }
  func.func @transform_1(%arg0: i32) -> (i32, i32) {
    %c0_i32 = arith.constant 0 : i32
    %c0_i32_0 = arith.constant 0 : i32
    return %arg0, %c0_i32 : i32, i32
  }
  func.func @transform_2(%arg0: i32) -> (i32, i32) {
    %c0_i32 = arith.constant 0 : i32
    %c0_i32_0 = arith.constant 0 : i32
    %c0_i32_1 = arith.constant 0 : i32
    return %c0_i32, %c0_i32_0 : i32, i32
  }
  func.func @transform_3(%arg0: i32) -> (i32, i32) {
    %c0_i32 = arith.constant 0 : i32
    %c0_i32_0 = arith.constant 0 : i32
    %c0_i32_1 = arith.constant 0 : i32
    return %c0_i32, %c0_i32_0 : i32, i32
  }
  func.func @transform_4(%arg0: i32) -> (i32, i32) {
    %c0_i32 = arith.constant 0 : i32
    %c0_i32_0 = arith.constant 0 : i32
    return %arg0, %c0_i32 : i32, i32
  }
  func.func @transform_5(%arg0: i32) -> (i32, i32) {
    %c0_i32 = arith.constant 0 : i32
    %c0_i32_0 = arith.constant 0 : i32
    return %arg0, %c0_i32 : i32, i32
  }
}

module attributes {stable_mosaic.version = 11 : i64} {
  func.func @prop_kernel(%arg0: i32, %arg1: i32, %arg2: memref<2xf32, #tpu.memory_space<smem>>, %arg3: memref<8x8xbf16, #tpu.memory_space<vmem>>, %arg4: memref<8x8xbf16, #tpu.memory_space<vmem>>, %arg5: memref<8x256xbf16, #tpu.memory_space<vmem>>, %arg6: memref<8x256xbf16, #tpu.memory_space<vmem>>, %arg7: memref<1x256xf32, #tpu.memory_space<vmem>>, %arg8: memref<1x256xf32, #tpu.memory_space<vmem>>, %arg9: memref<8x256xf32, #tpu.memory_space<vmem>>, %arg10: memref<8x256xf32, #tpu.memory_space<vmem>>, %arg11: memref<8x256xf32, #tpu.memory_space<vmem>>, %arg12: memref<8x256xf32, #tpu.memory_space<vmem>>) attributes {dimension_semantics = [#tpu.dimension_semantics<parallel>, #tpu.dimension_semantics<arbitrary>], iteration_bounds = array<i64: 1, 1>, scalar_prefetch = 0 : i64, scratch_operands = 2 : i64, tpu.core_type = #tpu.core_type<tc>, window_params = [{transform_indices = @transform_0, window_bounds = array<i64: 2>}, {transform_indices = @transform_1, window_bounds = array<i64: 8, 8>}, {transform_indices = @transform_2, window_bounds = array<i64: 8, 8>}, {transform_indices = @transform_3, window_bounds = array<i64: 8, 256>}, {transform_indices = @transform_4, window_bounds = array<i64: 8, 256>}, {pipeline_mode = #tpu.pipeline_mode<synchronous>, transform_indices = @transform_5, window_bounds = array<i64: 1, 256>}, {pipeline_mode = #tpu.pipeline_mode<synchronous>, transform_indices = @transform_6, window_bounds = array<i64: 1, 256>}, {transform_indices = @transform_7, window_bounds = array<i64: 8, 256>}, {transform_indices = @transform_8, window_bounds = array<i64: 8, 256>}]} {
    %c0_i32 = arith.constant 0 : i32
    %0 = arith.cmpi eq, %arg1, %c0_i32 : i32
    %1 = arith.extui %0 : i1 to i32
    %c0_i32_0 = arith.constant 0 : i32
    %2 = arith.cmpi ne, %1, %c0_i32_0 : i32
    scf.if %2 {
      %cst_19 = arith.constant 0.000000e+00 : f32
      %18 = vector.broadcast %cst_19 : f32 to vector<8x256xf32>
      %c0_20 = arith.constant 0 : index
      %c0_21 = arith.constant 0 : index
      %19 = vector.load %arg11[%c0_20, %c0_21] : memref<8x256xf32, #tpu.memory_space<vmem>>, vector<8x256xf32>
      tpu.vector_store %arg11[%c0_20, %c0_21], %18 {strides = array<i32>} : memref<8x256xf32, #tpu.memory_space<vmem>>, vector<8x256xf32>,
      %cst_22 = arith.constant 0.000000e+00 : f32
      %20 = vector.broadcast %cst_22 : f32 to vector<8x256xf32>
      %c0_23 = arith.constant 0 : index
      %c0_24 = arith.constant 0 : index
      %21 = vector.load %arg12[%c0_23, %c0_24] : memref<8x256xf32, #tpu.memory_space<vmem>>, vector<8x256xf32>
      tpu.vector_store %arg12[%c0_23, %c0_24], %20 {strides = array<i32>} : memref<8x256xf32, #tpu.memory_space<vmem>>, vector<8x256xf32>,
    } else {
    }
    %c0 = arith.constant 0 : index
    %c0_1 = arith.constant 0 : index
    %3 = vector.load %arg11[%c0, %c0_1] : memref<8x256xf32, #tpu.memory_space<vmem>>, vector<8x256xf32>
    %c0_2 = arith.constant 0 : index
    %c0_3 = arith.constant 0 : index
    %4 = vector.load %arg3[%c0_2, %c0_3] : memref<8x8xbf16, #tpu.memory_space<vmem>>, vector<8x8xbf16>
    %c0_4 = arith.constant 0 : index
    %c0_5 = arith.constant 0 : index
    %5 = vector.load %arg5[%c0_4, %c0_5] : memref<8x256xbf16, #tpu.memory_space<vmem>>, vector<8x256xbf16>
    %cst = arith.constant dense<0.000000e+00> : vector<8x256xf32>
    %6 = tpu.matmul %4, %5, %cst {dimension_numbers = #tpu.dot_dimension_numbers<[1], [0], [0], [1], [0, 0, 1, 1], [], []>} : vector<8x8xbf16>, vector<8x256xbf16>, vector<8x256xf32> -> vector<8x256xf32>
    %7 = arith.addf %3, %6 : vector<8x256xf32>
    %c0_6 = arith.constant 0 : index
    %c0_7 = arith.constant 0 : index
    %8 = vector.load %arg11[%c0_6, %c0_7] : memref<8x256xf32, #tpu.memory_space<vmem>>, vector<8x256xf32>
    tpu.vector_store %arg11[%c0_6, %c0_7], %7 {strides = array<i32>} : memref<8x256xf32, #tpu.memory_space<vmem>>, vector<8x256xf32>,
    %c0_8 = arith.constant 0 : index
    %c0_9 = arith.constant 0 : index
    %9 = vector.load %arg12[%c0_8, %c0_9] : memref<8x256xf32, #tpu.memory_space<vmem>>, vector<8x256xf32>
    %c0_10 = arith.constant 0 : index
    %c0_11 = arith.constant 0 : index
    %10 = vector.load %arg4[%c0_10, %c0_11] : memref<8x8xbf16, #tpu.memory_space<vmem>>, vector<8x8xbf16>
    %c0_12 = arith.constant 0 : index
    %c0_13 = arith.constant 0 : index
    %11 = vector.load %arg6[%c0_12, %c0_13] : memref<8x256xbf16, #tpu.memory_space<vmem>>, vector<8x256xbf16>
    %cst_14 = arith.constant dense<0.000000e+00> : vector<8x256xf32>
    %12 = tpu.matmul %10, %11, %cst_14 {dimension_numbers = #tpu.dot_dimension_numbers<[1], [0], [0], [1], [0, 0, 1, 1], [], []>} : vector<8x8xbf16>, vector<8x256xbf16>, vector<8x256xf32> -> vector<8x256xf32>
    %13 = arith.addf %9, %12 : vector<8x256xf32>
    %c0_15 = arith.constant 0 : index
    %c0_16 = arith.constant 0 : index
    %14 = vector.load %arg12[%c0_15, %c0_16] : memref<8x256xf32, #tpu.memory_space<vmem>>, vector<8x256xf32>
    tpu.vector_store %arg12[%c0_15, %c0_16], %13 {strides = array<i32>} : memref<8x256xf32, #tpu.memory_space<vmem>>, vector<8x256xf32>,
    %c0_i32_17 = arith.constant 0 : i32
    %15 = arith.cmpi eq, %arg1, %c0_i32_17 : i32
    %16 = arith.extui %15 : i1 to i32
    %c0_i32_18 = arith.constant 0 : i32
    %17 = arith.cmpi ne, %16, %c0_i32_18 : i32
    scf.if %17 {
      %c0_19 = arith.constant 0 : index
      %18 = memref.load %arg2[%c0_19] : memref<2xf32, #tpu.memory_space<smem>>
      %c1 = arith.constant 1 : index
      %19 = memref.load %arg2[%c1] : memref<2xf32, #tpu.memory_space<smem>>
      %c0_20 = arith.constant 0 : index
      %c0_21 = arith.constant 0 : index
      %20 = vector.load %arg11[%c0_20, %c0_21] : memref<8x256xf32, #tpu.memory_space<vmem>>, vector<8x256xf32>
      %c0_22 = arith.constant 0 : index
      %c0_23 = arith.constant 0 : index
      %21 = vector.load %arg7[%c0_22, %c0_23] : memref<1x256xf32, #tpu.memory_space<vmem>>, vector<1x256xf32>
      %22 = vector.broadcast %21 : vector<1x256xf32> to vector<8x256xf32>
      %23 = arith.addf %20, %22 : vector<8x256xf32>
      %cst_24 = arith.constant 0.000000e+00 : f32
      %24 = vector.broadcast %cst_24 : f32 to vector<8x256xf32>
      %25 = arith.cmpf oge, %23, %24 : vector<8x256xf32>
      %26 = vector.broadcast %18 : f32 to vector<8x256xf32>
      %27 = arith.mulf %26, %23 : vector<8x256xf32>
      %28 = arith.select %25, %23, %27 : vector<8x256xi1>, vector<8x256xf32>
      %c0_25 = arith.constant 0 : index
      %c0_26 = arith.constant 0 : index
      %29 = vector.load %arg9[%c0_25, %c0_26] : memref<8x256xf32, #tpu.memory_space<vmem>>, vector<8x256xf32>
      tpu.vector_store %arg9[%c0_25, %c0_26], %28 {strides = array<i32>} : memref<8x256xf32, #tpu.memory_space<vmem>>, vector<8x256xf32>,
      %c0_27 = arith.constant 0 : index
      %c0_28 = arith.constant 0 : index
      %30 = vector.load %arg12[%c0_27, %c0_28] : memref<8x256xf32, #tpu.memory_space<vmem>>, vector<8x256xf32>
      %c0_29 = arith.constant 0 : index
      %c0_30 = arith.constant 0 : index
      %31 = vector.load %arg8[%c0_29, %c0_30] : memref<1x256xf32, #tpu.memory_space<vmem>>, vector<1x256xf32>
      %32 = vector.broadcast %31 : vector<1x256xf32> to vector<8x256xf32>
      %33 = arith.addf %30, %32 : vector<8x256xf32>
      %cst_31 = arith.constant 0.000000e+00 : f32
      %34 = vector.broadcast %cst_31 : f32 to vector<8x256xf32>
      %35 = arith.cmpf oge, %33, %34 : vector<8x256xf32>
      %36 = vector.broadcast %19 : f32 to vector<8x256xf32>
      %37 = arith.mulf %36, %33 : vector<8x256xf32>
      %38 = arith.select %35, %33, %37 : vector<8x256xi1>, vector<8x256xf32>
      %c0_32 = arith.constant 0 : index
      %c0_33 = arith.constant 0 : index
      %39 = vector.load %arg10[%c0_32, %c0_33] : memref<8x256xf32, #tpu.memory_space<vmem>>, vector<8x256xf32>
      tpu.vector_store %arg10[%c0_32, %c0_33], %38 {strides = array<i32>} : memref<8x256xf32, #tpu.memory_space<vmem>>, vector<8x256xf32>,
    } else {
    }
    return
  }
  func.func @transform_0(%arg0: i32, %arg1: i32) -> i32 {
    %c0_i32 = arith.constant 0 : i32
    %c0_i32_0 = arith.constant 0 : i32
    return %c0_i32 : i32
  }
  func.func @transform_1(%arg0: i32, %arg1: i32) -> (i32, i32) {
    %c0_i32 = arith.constant 0 : i32
    return %arg0, %arg1 : i32, i32
  }
  func.func @transform_2(%arg0: i32, %arg1: i32) -> (i32, i32) {
    %c0_i32 = arith.constant 0 : i32
    return %arg0, %arg1 : i32, i32
  }
  func.func @transform_3(%arg0: i32, %arg1: i32) -> (i32, i32) {
    %c0_i32 = arith.constant 0 : i32
    %c0_i32_0 = arith.constant 0 : i32
    return %arg1, %c0_i32 : i32, i32
  }
  func.func @transform_4(%arg0: i32, %arg1: i32) -> (i32, i32) {
    %c0_i32 = arith.constant 0 : i32
    %c0_i32_0 = arith.constant 0 : i32
    return %arg1, %c0_i32 : i32, i32
  }
  func.func @transform_5(%arg0: i32, %arg1: i32) -> (i32, i32) {
    %c0_i32 = arith.constant 0 : i32
    %c0_i32_0 = arith.constant 0 : i32
    %c0_i32_1 = arith.constant 0 : i32
    return %c0_i32, %c0_i32_0 : i32, i32
  }
  func.func @transform_6(%arg0: i32, %arg1: i32) -> (i32, i32) {
    %c0_i32 = arith.constant 0 : i32
    %c0_i32_0 = arith.constant 0 : i32
    %c0_i32_1 = arith.constant 0 : i32
    return %c0_i32, %c0_i32_0 : i32, i32
  }
  func.func @transform_7(%arg0: i32, %arg1: i32) -> (i32, i32) {
    %c0_i32 = arith.constant 0 : i32
    %c0_i32_0 = arith.constant 0 : i32
    return %arg0, %c0_i32 : i32, i32
  }
  func.func @transform_8(%arg0: i32, %arg1: i32) -> (i32, i32) {
    %c0_i32 = arith.constant 0 : i32
    %c0_i32_0 = arith.constant 0 : i32
    return %arg0, %c0_i32 : i32, i32
  }
}

module attributes {stable_mosaic.version = 11 : i64} {
  func.func @disc_kernel(%arg0: i32, %arg1: memref<1xf32, #tpu.memory_space<smem>>, %arg2: memref<8x256xf32, #tpu.memory_space<vmem>>, %arg3: memref<8x256xf32, #tpu.memory_space<vmem>>, %arg4: memref<256x128xf32, #tpu.memory_space<vmem>>, %arg5: memref<256x128xf32, #tpu.memory_space<vmem>>, %arg6: memref<8x128xf32, #tpu.memory_space<vmem>>) attributes {dimension_semantics = [#tpu.dimension_semantics<parallel>], iteration_bounds = array<i64: 1>, scalar_prefetch = 0 : i64, scratch_operands = 0 : i64, tpu.core_type = #tpu.core_type<tc>, window_params = [{transform_indices = @transform_0, window_bounds = array<i64: 1>}, {transform_indices = @transform_1, window_bounds = array<i64: 8, 256>}, {transform_indices = @transform_2, window_bounds = array<i64: 8, 256>}, {pipeline_mode = #tpu.pipeline_mode<synchronous>, transform_indices = @transform_3, window_bounds = array<i64: 256, 128>}, {pipeline_mode = #tpu.pipeline_mode<synchronous>, transform_indices = @transform_4, window_bounds = array<i64: 256, 128>}, {transform_indices = @transform_5, window_bounds = array<i64: 8, 128>}]} {
    %c0 = arith.constant 0 : index
    %c0_0 = arith.constant 0 : index
    %0 = vector.load %arg2[%c0, %c0_0] : memref<8x256xf32, #tpu.memory_space<vmem>>, vector<8x256xf32>
    %c0_1 = arith.constant 0 : index
    %c0_2 = arith.constant 0 : index
    %1 = vector.load %arg4[%c0_1, %c0_2] : memref<256x128xf32, #tpu.memory_space<vmem>>, vector<256x128xf32>
    %cst = arith.constant dense<0.000000e+00> : vector<8x128xf32>
    %2 = tpu.matmul %0, %1, %cst {dimension_numbers = #tpu.dot_dimension_numbers<[1], [0], [0], [1], [0, 0, 1, 1], [], []>} : vector<8x256xf32>, vector<256x128xf32>, vector<8x128xf32> -> vector<8x128xf32>
    %c0_3 = arith.constant 0 : index
    %c0_4 = arith.constant 0 : index
    %3 = vector.load %arg3[%c0_3, %c0_4] : memref<8x256xf32, #tpu.memory_space<vmem>>, vector<8x256xf32>
    %c0_5 = arith.constant 0 : index
    %c0_6 = arith.constant 0 : index
    %4 = vector.load %arg5[%c0_5, %c0_6] : memref<256x128xf32, #tpu.memory_space<vmem>>, vector<256x128xf32>
    %cst_7 = arith.constant dense<0.000000e+00> : vector<8x128xf32>
    %5 = tpu.matmul %3, %4, %cst_7 {dimension_numbers = #tpu.dot_dimension_numbers<[1], [0], [0], [1], [0, 0, 1, 1], [], []>} : vector<8x256xf32>, vector<256x128xf32>, vector<8x128xf32> -> vector<8x128xf32>
    %6 = arith.addf %2, %5 : vector<8x128xf32>
    %c0_8 = arith.constant 0 : index
    %7 = memref.load %arg1[%c0_8] : memref<1xf32, #tpu.memory_space<smem>>
    %8 = vector.broadcast %7 : f32 to vector<8x128xf32>
    %9 = arith.addf %6, %8 : vector<8x128xf32>
    %c0_9 = arith.constant 0 : index
    %c0_10 = arith.constant 0 : index
    %10 = vector.load %arg6[%c0_9, %c0_10] : memref<8x128xf32, #tpu.memory_space<vmem>>, vector<8x128xf32>
    tpu.vector_store %arg6[%c0_9, %c0_10], %9 {strides = array<i32>} : memref<8x128xf32, #tpu.memory_space<vmem>>, vector<8x128xf32>,
    return
  }
  func.func @transform_0(%arg0: i32) -> i32 {
    %c0_i32 = arith.constant 0 : i32
    %c0_i32_0 = arith.constant 0 : i32
    return %c0_i32 : i32
  }
  func.func @transform_1(%arg0: i32) -> (i32, i32) {
    %c0_i32 = arith.constant 0 : i32
    %c0_i32_0 = arith.constant 0 : i32
    return %arg0, %c0_i32 : i32, i32
  }
  func.func @transform_2(%arg0: i32) -> (i32, i32) {
    %c0_i32 = arith.constant 0 : i32
    %c0_i32_0 = arith.constant 0 : i32
    return %arg0, %c0_i32 : i32, i32
  }
  func.func @transform_3(%arg0: i32) -> (i32, i32) {
    %c0_i32 = arith.constant 0 : i32
    %c0_i32_0 = arith.constant 0 : i32
    %c0_i32_1 = arith.constant 0 : i32
    return %c0_i32, %c0_i32_0 : i32, i32
  }
  func.func @transform_4(%arg0: i32) -> (i32, i32) {
    %c0_i32 = arith.constant 0 : i32
    %c0_i32_0 = arith.constant 0 : i32
    %c0_i32_1 = arith.constant 0 : i32
    return %c0_i32, %c0_i32_0 : i32, i32
  }
  func.func @transform_5(%arg0: i32) -> (i32, i32) {
    %c0_i32 = arith.constant 0 : i32
    %c0_i32_0 = arith.constant 0 : i32
    return %arg0, %c0_i32 : i32, i32
  }
}

</mosaic_0001>

<bundles_post_ra>
// kernel: model_forward.3
= control target key start
LH: loop header
LB: loop body
LE: loop exit
PB: predicated region body
PF: predicated region fallthrough
CT: control target
= control target key end

     0   :  { %v387_v0 = vmov 0.0|0.0   ;;  %vm388_vm0 = vmmov 0   ;;  %v389_v4 = vmov 0.0   ;;  %vm25_vm1 = vcmask 130048   ;;  %s454_s2 = inlined_call_operand.vmem [shape: f32[16,128], index: 2, kind: input, shape index: {}]   ;;  %s455_s3 = inlined_call_operand.vmem [shape: f32[16,128], index: 3, kind: input, shape index: {}]   ;;  %s456_s0 = inlined_call_operand.vmem [shape: f32[8,16], index: 0, kind: input, shape index: {}]   ;;  %s457_s1 = inlined_call_operand.vmem [shape: f32[8,16], index: 1, kind: input, shape index: {}]   ;;  %s458_s4 = inlined_call_operand.vmem [shape: bf16[8,256], index: 4, kind: output, shape index: {0}]   ;;  %s459_s5 = inlined_call_operand.vmem [shape: bf16[8,256], index: 5, kind: output, shape index: {1}]  }
   0x1   :  { %372 = vmatprep.subr.bf16.mxu0 %v387_v0  ;;  %375 = vmatprep.subr.bf16.mxu1 %v387_v0  ;;  %v21_v1 = vld [vmem:[%s454_s2] sm:$0xff]  ;;  %v22_v2 = vld [vmem:[%s454_s2 + $0x8] sm:$0xff] }
   0x2   :  { %v373_v3 = vpack.c.bf16 %v22_v2, %v21_v1  ;;  %348 = vmatprep.mubr.msk.f32.mxu0 %vm388_vm0, %v389_v4  ;;  %355 = vmatprep.mubr.msk.f32.mxu1 %vm388_vm0, %v389_v4  ;;  %v23_v5 = vld [vmem:[%s455_s3] sm:$0xff]  ;;  %v24_v6 = vld [vmem:[%s455_s3 + $0x8] sm:$0xff] }
   0x3   :  { %v19_v7 = vld [vmem:[%s456_s0] sm:$0xff]  ;;  %v379_v9 = vpack.c.bf16 %v24_v6, %v23_v5 }
   0x4   :  { %374 = vmatpush3.bf16.msra.mxu0 %v373_v3  ;;  %377 = vmatpush3.bf16.msra.mxu1 %v373_v3  ;;  %v20_v8 = vld [vmem:[%s457_s1] sm:$0xff] }
   0x5   :  { %378 = vmatprep.subr.bf16.mxu0 %v387_v0  ;;  %381 = vmatprep.subr.bf16.mxu1 %v387_v0 }
   0x7   :  { %349 = vmatmul.mubr.msk.f32.vlgmr.msra.gmra.mrb[0].mxu0 %vm25_vm1, %v19_v7  ;;  %356 = vmatmul.mubr.msk.f32.vlgmr.msra.gmra.mrb[0].mxu1 %vm25_vm1, %v20_v8 }
   0x8   :  { %380 = vmatpush3.bf16.msra.mxu0 %v379_v9  ;;  %383 = vmatpush3.bf16.msra.mxu1 %v379_v9 }
   0x9   :  { %362 = vmatprep.mubr.msk.f32.mxu0 %vm388_vm0, %v389_v4  ;;  %369 = vmatprep.mubr.msk.f32.mxu1 %vm388_vm0, %v389_v4 }
   0xb   :  { %363 = vmatmul.mubr.msk.f32.vlgmr.msra.gmra.mrb[2].mxu0 %vm25_vm1, %v19_v7  ;;  %370 = vmatmul.mubr.msk.f32.vlgmr.msra.gmra.mrb[2].mxu1 %vm25_vm1, %v20_v8 }
  0xda   :  { %v95_v10 = vpop.f32.mrb[0].mxu0  ;;  %v170_v11 = vpop.f32.mrb[0].mxu1 }
  0xdb   :  { %v99_v12 = vpack.c.bf16 %v95_v10, %v95_v10  ;;  %v174_v13 = vpack.c.bf16 %v170_v11, %v170_v11  ;;  %v350_v14 = vpop.f32.mrb[1].mxu0  ;;  %v357_v15 = vpop.f32.mrb[1].mxu1 }
  0xdd   :  { %100 = vst [vmem:[%s458_s4] sm:$0xf] %v99_v12  ;;  %175 = vst [vmem:[%s458_s4 + $0x4] sm:$0xf] %v174_v13 }
  0xde   :  { %v242_v16 = vpop.f32.mrb[2].mxu0  ;;  %v314_v17 = vpop.f32.mrb[2].mxu1 }
  0xdf   :  { %v246_v18 = vpack.c.bf16 %v242_v16, %v242_v16  ;;  %v318_v19 = vpack.c.bf16 %v314_v17, %v314_v17  ;;  %v364_v20 = vpop.f32.mrb[3].mxu0  ;;  %v371_v21 = vpop.f32.mrb[3].mxu1 }
  0xe1   :  { %247 = vst [vmem:[%s459_s5] sm:$0xf] %v246_v18  ;;  %319 = vst [vmem:[%s459_s5 + $0x4] sm:$0xf] %v318_v19 }

// kernel: model_forward.4
= control target key start
LH: loop header
LB: loop body
LE: loop exit
PB: predicated region body
PF: predicated region fallthrough
CT: control target
= control target key end

     0   :  { %14 = vsyncpa [#allocation5], 0  ;;  %s351_s0 = inlined_call_operand.vmem [shape: f32[2], index: 0, kind: input, shape index: {}]   ;;  %s352_s1 = inlined_call_operand.vmem [shape: bf16[8,8], index: 1, kind: input, shape index: {}]   ;;  %s353_s2 = inlined_call_operand.vmem [shape: bf16[8,8], index: 2, kind: input, shape index: {}]   ;;  %s354_s3 = inlined_call_operand.vmem [shape: bf16[8,256], index: 3, kind: input, shape index: {}]   ;;  %s355_s4 = inlined_call_operand.vmem [shape: bf16[8,256], index: 4, kind: input, shape index: {}]   ;;  %s356_s5 = inlined_call_operand.vmem [shape: f32[1,256], index: 5, kind: input, shape index: {}]   ;;  %s357_s6 = inlined_call_operand.vmem [shape: f32[1,256], index: 6, kind: input, shape index: {}]   ;;  %s358_s7 = inlined_call_operand.vmem [shape: f32[8,256], index: 7, kind: output, shape index: {0}]   ;;  %s359_s8 = inlined_call_operand.vmem [shape: f32[8,256], index: 8, kind: output, shape index: {1}]  }
   0x1   :  { %s21_s29 = sshll.u32 %s351_s0, 4  ;;  %s22_s29 = int_to_ptr.vmem [resolvable:$true] %s21_s29 }
   0x2   :  { %s257_s30 = scalar_lea.vmem %s22_s29, 16  ;;  %p262_p1 = scmp.lt.s32.totalorder %s22_s29, %s22_s29 }
   0x3   :  { %p258_p0 = scmp.ne.s32.totalorder %s22_s29, %s257_s30  ;;  %p263_p2 = scmp.lt.s32.totalorder %s257_s30, %s257_s30 }
   0x5   :  { %p264_p3 = por %p263_p2, %p262_p1 }
   0x7   :  { %p265_p4 = pnand %p264_p3, %p258_p0 }
   0x9   :  { %268 = shalt.err (!%p265_p4)
}
   0xa   :  { %s271_s9 = smov [#allocation4]  }
   0xb   :  { %24 = dma.vmem_to_smem %s22_s29, 16, %s271_s9, [#allocation5]  }
   0xc   :  { %269 = dma.done.wait [#allocation5], 16  }
   0xd   :  { %270 = vsyncadd [#allocation5], 4294967280 }
   0xe   :  { %40 = sfence }
   0xf   :  { %v53_v0 = vld [vmem:[%s354_s3] sm:$0xff]  ;;  %vm63_vm0 = vcmask 1043456   ;;  %v272_v6 = vmov 0   ;;  %vm59_vm1 = vcmask 64512   ;;  %v187_v11 = vlaneseq  ;;  %s181_s15 = sld [smem:[#allocation4]]  ;;  %s250_s16 = sld [smem:[#allocation4 + $0x1]] }
  0x10   :  { %v118_v1 = vld [vmem:[%s355_s4] sm:$0xff]  ;;  %v243_v2 = vcombine.high %v53_v0, %v53_v0  ;;  %v242_v4 = vcombine.low %v53_v0, %v53_v0  ;;  %102 = vmatprep.mubr.bf16.mxu0 %v272_v6  ;;  %165 = vmatprep.mubr.bf16.mxu1 %v272_v6 }
  0x11   :  { %v247_v3 = vcombine.high %v118_v1, %v118_v1  ;;  %v246_v5 = vcombine.low %v118_v1, %v118_v1  ;;  %v52_v9 = vld [vmem:[%s352_s1] sm:$0xf]  ;;  %v188_v12 = vshrl.u32 %v187_v11, 7 }
  0x12   :  { %244 = vmatprep.subr.msk.bf16.mxu0 %vm63_vm0, %v243_v2  ;;  %v65_v7 = vsel %vm63_vm0, %v242_v4, 0  ;;  %v117_v10 = vld [vmem:[%s353_s2] sm:$0xf] }
  0x13   :  { %248 = vmatprep.subr.msk.bf16.mxu1 %vm63_vm0, %v247_v3  ;;  %v128_v8 = vsel %vm63_vm0, %v246_v5, 0  ;;  %71 = vmatpush1.bf16.msra.mxu0 %v65_v7  ;;  %v189_v13 = vsub.s32 0, %v188_v12  ;;  %v185_v14 = vld [vmem:[%s356_s5] sm:$0x3]  ;;  %v193_v16 = vsub.s32 1, %v188_v12 }
  0x14   :  { %134 = vmatpush1.bf16.msra.mxu1 %v128_v8  ;;  %v210_v15 = vld [vmem:[%s357_s6] sm:$0x3] }
  0x15   :  { %v190_v17 = vrot.slane %v185_v14, %v189_v13  ;;  %v215_v18 = vrot.slane %v210_v15, %v189_v13  ;;  %v194_v19 = vrot.slane %v185_v14, %v193_v16  ;;  %v219_v20 = vrot.slane %v210_v15, %v193_v16 }
  0x16   :  { %245 = vmatmul.mubr.msk.bf16.vlgmr.msra.gmra.mrb[0].mxu0 %vm59_vm1, %v52_v9  ;;  %v201_v22 = vstv %s181_s15  ;;  %v226_v24 = vstv %s250_s16 }
  0x17   :  { %249 = vmatmul.mubr.msk.bf16.vlgmr.msra.gmra.mrb[0].mxu1 %vm59_vm1, %v117_v10 }
  0xe9   :  { %v104_v21 = vpop.f32.mrb[0].mxu0 }
  0xea   :  { %v167_v23 = vpop.f32.mrb[0].mxu1  ;;  %v197_v25 = vadd.f32 %v190_v17, %v104_v21  ;;  %v106_v27 = vpop.f32.mrb[1].mxu0 }
  0xeb   :  { %v222_v26 = vadd.f32 %v215_v18, %v167_v23  ;;  %v169_v28 = vpop.f32.mrb[1].mxu1  ;;  %v198_v29 = vadd.f32 %v194_v19, %v106_v27  ;;  %v108_v31 = vpop.f32.mrb[2].mxu0 }
  0xec   :  { %v223_v30 = vadd.f32 %v219_v20, %v169_v28  ;;  %v171_v32 = vpop.f32.mrb[2].mxu1  ;;  %vm199_vm2 = vcmp.ge.f32.partialorder %v197_v25, 0.0  ;;  %v202_v33 = vmul.f32 %v201_v22, %v197_v25  ;;  %v109_v35 = vpop.f32.mrb[3].mxu0 }
  0xed   :  { %vm224_vm3 = vcmp.ge.f32.partialorder %v222_v26, 0.0  ;;  %v227_v34 = vmul.f32 %v226_v24, %v222_v26  ;;  %v172_v36 = vpop.f32.mrb[3].mxu1  ;;  %vm200_vm4 = vcmp.ge.f32.partialorder %v198_v29, 0.0  ;;  %v203_v37 = vmul.f32 %v201_v22, %v198_v29 }
  0xee   :  { %vm225_vm5 = vcmp.ge.f32.partialorder %v223_v30, 0.0  ;;  %v228_v38 = vmul.f32 %v226_v24, %v223_v30  ;;  %v204_v39 = vsel %vm199_vm2, %v197_v25, %v202_v33 }
  0xef   :  { %v229_v40 = vsel %vm224_vm3, %v222_v26, %v227_v34  ;;  %206 = vst [vmem:[%s358_s7] sm:$0xff] %v204_v39  ;;  %v205_v41 = vsel %vm200_vm4, %v198_v29, %v203_v37 }
  0xf0   :  { %231 = vst [vmem:[%s359_s8] sm:$0xff] %v229_v40  ;;  %v230_v42 = vsel %vm225_vm5, %v223_v30, %v228_v38  ;;  %207 = vst [vmem:[%s358_s7 + $0x8] sm:$0xff] %v205_v41 }
  0xf1   :  { %232 = vst [vmem:[%s359_s8 + $0x8] sm:$0xff] %v230_v42 }
  0xf2   :  { %241 = vsyncpa [#allocation5], 1 }

// kernel: model_forward.5
= control target key start
LH: loop header
LB: loop body
LE: loop exit
PB: predicated region body
PF: predicated region fallthrough
CT: control target
= control target key end

     0   :  { %s611_s4 = inlined_call_operand.vmem [shape: f32[256,128], index: 4, kind: input, shape index: {}]   ;;  %s612_s3 = inlined_call_operand.vmem [shape: f32[256,128], index: 3, kind: input, shape index: {}]   ;;  %s613_s2 = inlined_call_operand.vmem [shape: f32[8,256], index: 2, kind: input, shape index: {}]   ;;  %s614_s1 = inlined_call_operand.vmem [shape: f32[8,256], index: 1, kind: input, shape index: {}]   ;;  %s615_s0 = inlined_call_operand.<no memory space> [shape: f32[1], index: 0, kind: input, shape index: {}]   ;;  %s616_s5 = inlined_call_operand.vmem [shape: f32[8,128], index: 5, kind: output, shape index: {}]  }
   0x1   :  { %v73_v0 = vld [vmem:[%s611_s4 + $0x80] sm:$0xff]  ;;  %v74_v1 = vld [vmem:[%s611_s4 + $0x88] sm:$0xff]  ;;  %v75_v11 = vld [vmem:[%s611_s4 + $0x90] sm:$0xff] }
   0x2   :  { %v39_v2 = vld [vmem:[%s612_s3 + $0x80] sm:$0xff]  ;;  %v307_v3 = vpack.c.bf16 %v74_v1, %v73_v0  ;;  %v40_v4 = vld [vmem:[%s612_s3 + $0x88] sm:$0xff]  ;;  %v76_v13 = vld [vmem:[%s611_s4 + $0x98] sm:$0xff] }
   0x3   :  { %v57_v5 = vld [vmem:[%s611_s4] sm:$0xff]  ;;  %v58_v6 = vld [vmem:[%s611_s4 + $0x8] sm:$0xff]  ;;  %v339_v7 = vpack.c.bf16 %v40_v4, %v39_v2  ;;  %v41_v14 = vld [vmem:[%s612_s3 + $0x90] sm:$0xff]  ;;  %v311_v16 = vpack.c.bf16 %v76_v13, %v75_v11 }
   0x4   :  { %v309_v8 = vpack.c.bf16 %v58_v6, %v57_v5  ;;  %v23_v9 = vld [vmem:[%s612_s3] sm:$0xff]  ;;  %v24_v10 = vld [vmem:[%s612_s3 + $0x8] sm:$0xff]  ;;  %308 = vmatprep.subr.bf16.mxu0 %v307_v3  ;;  %v42_v15 = vld [vmem:[%s612_s3 + $0x98] sm:$0xff] }
   0x5   :  { %v341_v12 = vpack.c.bf16 %v24_v10, %v23_v9  ;;  %340 = vmatprep.subr.bf16.mxu1 %v339_v7  ;;  %v343_v17 = vpack.c.bf16 %v42_v15, %v41_v14  ;;  %v59_v18 = vld [vmem:[%s611_s4 + $0x10] sm:$0xff]  ;;  %v60_v19 = vld [vmem:[%s611_s4 + $0x18] sm:$0xff]  ;;  %v77_v23 = vld [vmem:[%s611_s4 + $0xa0] sm:$0xff] }
   0x6   :  { %310 = vmatpush3.bf16.msra.mxu0 %v309_v8  ;;  %v25_v20 = vld [vmem:[%s612_s3 + $0x10] sm:$0xff]  ;;  %v313_v21 = vpack.c.bf16 %v60_v19, %v59_v18  ;;  %v26_v22 = vld [vmem:[%s612_s3 + $0x18] sm:$0xff]  ;;  %v78_v24 = vld [vmem:[%s611_s4 + $0xa8] sm:$0xff] }
   0x7   :  { %342 = vmatpush3.bf16.msra.mxu1 %v341_v12  ;;  %312 = vmatprep.subr.bf16.mxu0 %v311_v16  ;;  %v345_v25 = vpack.c.bf16 %v26_v22, %v25_v20  ;;  %v315_v26 = vpack.c.bf16 %v78_v24, %v77_v23  ;;  %v43_v27 = vld [vmem:[%s612_s3 + $0xa0] sm:$0xff]  ;;  %v44_v28 = vld [vmem:[%s612_s3 + $0xa8] sm:$0xff]  ;;  %v79_v35 = vld [vmem:[%s611_s4 + $0xb0] sm:$0xff] }
   0x8   :  { %344 = vmatprep.subr.bf16.mxu1 %v343_v17  ;;  %v61_v29 = vld [vmem:[%s611_s4 + $0x20] sm:$0xff]  ;;  %v347_v30 = vpack.c.bf16 %v44_v28, %v43_v27  ;;  %v62_v31 = vld [vmem:[%s611_s4 + $0x28] sm:$0xff]  ;;  %v80_v36 = vld [vmem:[%s611_s4 + $0xb8] sm:$0xff] }
   0x9   :  { %v27_v32 = vld [vmem:[%s612_s3 + $0x20] sm:$0xff]  ;;  %v28_v33 = vld [vmem:[%s612_s3 + $0x28] sm:$0xff]  ;;  %v317_v34 = vpack.c.bf16 %v62_v31, %v61_v29  ;;  %v45_v37 = vld [vmem:[%s612_s3 + $0xb0] sm:$0xff]  ;;  %v319_v39 = vpack.c.bf16 %v80_v36, %v79_v35 }
   0xa   :  { %314 = vmatpush3.bf16.msra.mxu0 %v313_v21  ;;  %v349_v38 = vpack.c.bf16 %v28_v33, %v27_v32  ;;  %v46_v40 = vld [vmem:[%s612_s3 + $0xb8] sm:$0xff]  ;;  %v63_v41 = vld [vmem:[%s611_s4 + $0x30] sm:$0xff]  ;;  %v81_v46 = vld [vmem:[%s611_s4 + $0xc0] sm:$0xff] }
   0xb   :  { %346 = vmatpush3.bf16.msra.mxu1 %v345_v25  ;;  %316 = vmatprep.subr.bf16.mxu0 %v315_v26  ;;  %v64_v42 = vld [vmem:[%s611_s4 + $0x38] sm:$0xff]  ;;  %v351_v43 = vpack.c.bf16 %v46_v40, %v45_v37  ;;  %v29_v44 = vld [vmem:[%s612_s3 + $0x30] sm:$0xff]  ;;  %v82_v47 = vld [vmem:[%s611_s4 + $0xc8] sm:$0xff] }
   0xc   :  { %348 = vmatprep.subr.bf16.mxu1 %v347_v30  ;;  %v30_v45 = vld [vmem:[%s612_s3 + $0x38] sm:$0xff]  ;;  %v47_v48 = vld [vmem:[%s612_s3 + $0xc0] sm:$0xff]  ;;  %v48_v49 = vld [vmem:[%s612_s3 + $0xc8] sm:$0xff]  ;;  %v321_v50 = vpack.c.bf16 %v64_v42, %v63_v41  ;;  %v323_v52 = vpack.c.bf16 %v82_v47, %v81_v46  ;;  %v230_v42 = vstv %s615_s0 }
   0xd   :  { %v353_v51 = vpack.c.bf16 %v30_v45, %v29_v44  ;;  %v65_v53 = vld [vmem:[%s611_s4 + $0x40] sm:$0xff]  ;;  %v66_v54 = vld [vmem:[%s611_s4 + $0x48] sm:$0xff]  ;;  %v355_v56 = vpack.c.bf16 %v48_v49, %v47_v48  ;;  %v83_v58 = vld [vmem:[%s611_s4 + $0xd0] sm:$0xff] }
   0xe   :  { %318 = vmatpush3.bf16.msra.mxu0 %v317_v34  ;;  %v31_v55 = vld [vmem:[%s612_s3 + $0x40] sm:$0xff]  ;;  %v32_v57 = vld [vmem:[%s612_s3 + $0x48] sm:$0xff]  ;;  %v84_v59 = vld [vmem:[%s611_s4 + $0xd8] sm:$0xff]  ;;  %v325_v62 = vpack.c.bf16 %v66_v54, %v65_v53 }
   0xf   :  { %350 = vmatpush3.bf16.msra.mxu1 %v349_v38  ;;  %320 = vmatprep.subr.bf16.mxu0 %v319_v39  ;;  %v49_v60 = vld [vmem:[%s612_s3 + $0xd0] sm:$0xff]  ;;  %v50_v61 = vld [vmem:[%s612_s3 + $0xd8] sm:$0xff]  ;;  %v357_v63 = vpack.c.bf16 %v32_v57, %v31_v55  ;;  %v327_v0 = vpack.c.bf16 %v84_v59, %v83_v58  ;;  %v85_v6 = vld [vmem:[%s611_s4 + $0xe0] sm:$0xff] }
  0x10   :  { %352 = vmatprep.subr.bf16.mxu1 %v351_v43  ;;  %v67_v1 = vld [vmem:[%s611_s4 + $0x50] sm:$0xff]  ;;  %v68_v2 = vld [vmem:[%s611_s4 + $0x58] sm:$0xff]  ;;  %v359_v4 = vpack.c.bf16 %v50_v61, %v49_v60  ;;  %v86_v7 = vld [vmem:[%s611_s4 + $0xe8] sm:$0xff] }
  0x11   :  { %v33_v3 = vld [vmem:[%s612_s3 + $0x50] sm:$0xff]  ;;  %v34_v5 = vld [vmem:[%s612_s3 + $0x58] sm:$0xff]  ;;  %v51_v8 = vld [vmem:[%s612_s3 + $0xe0] sm:$0xff]  ;;  %v329_v10 = vpack.c.bf16 %v68_v2, %v67_v1  ;;  %v331_v14 = vpack.c.bf16 %v86_v7, %v85_v6 }
  0x12   :  { %322 = vmatpush3.bf16.msra.mxu0 %v321_v50  ;;  %v52_v9 = vld [vmem:[%s612_s3 + $0xe8] sm:$0xff]  ;;  %v69_v11 = vld [vmem:[%s611_s4 + $0x60] sm:$0xff]  ;;  %v361_v13 = vpack.c.bf16 %v34_v5, %v33_v3  ;;  %v87_v20 = vld [vmem:[%s611_s4 + $0xf0] sm:$0xff] }
  0x13   :  { %354 = vmatpush3.bf16.msra.mxu1 %v353_v51  ;;  %324 = vmatprep.subr.bf16.mxu0 %v323_v52  ;;  %v70_v12 = vld [vmem:[%s611_s4 + $0x68] sm:$0xff]  ;;  %v35_v15 = vld [vmem:[%s612_s3 + $0x60] sm:$0xff]  ;;  %v363_v18 = vpack.c.bf16 %v52_v9, %v51_v8  ;;  %v88_v21 = vld [vmem:[%s611_s4 + $0xf8] sm:$0xff] }
  0x14   :  { %356 = vmatprep.subr.bf16.mxu1 %v355_v56  ;;  %v56_v16 = vld [vmem:[%s613_s2 + $0x8] sm:$0xff]  ;;  %v53_v22 = vld [vmem:[%s612_s3 + $0xf0] sm:$0xff]  ;;  %v54_v23 = vld [vmem:[%s612_s3 + $0xf8] sm:$0xff]  ;;  %v333_v24 = vpack.c.bf16 %v70_v12, %v69_v11  ;;  %v335_v26 = vpack.c.bf16 %v88_v21, %v87_v20 }
  0x15   :  { %v22_v17 = vld [vmem:[%s614_s1 + $0x8] sm:$0xff]  ;;  %153 = vmatprep.mubr.f32.mxu0 %v56_v16  ;;  %v71_v27 = vld [vmem:[%s611_s4 + $0x70] sm:$0xff]  ;;  %v72_v28 = vld [vmem:[%s611_s4 + $0x78] sm:$0xff]  ;;  %v367_v29 = vpack.c.bf16 %v54_v23, %v53_v22 }
  0x16   :  { %326 = vmatpush3.bf16.msra.mxu0 %v325_v62  ;;  %v36_v19 = vld [vmem:[%s612_s3 + $0x68] sm:$0xff]  ;;  %223 = vmatprep.mubr.f32.mxu1 %v22_v17  ;;  %v37_v30 = vld [vmem:[%s612_s3 + $0x70] sm:$0xff]  ;;  %v38_v31 = vld [vmem:[%s612_s3 + $0x78] sm:$0xff]  ;;  %v337_v32 = vpack.c.bf16 %v72_v28, %v71_v27 }
  0x17   :  { %358 = vmatpush3.bf16.msra.mxu1 %v357_v63  ;;  %328 = vmatprep.subr.bf16.mxu0 %v327_v0  ;;  %v365_v25 = vpack.c.bf16 %v36_v19, %v35_v15  ;;  %v369_v33 = vpack.c.bf16 %v38_v31, %v37_v30  ;;  %v55_v34 = vld [vmem:[%s613_s2] sm:$0xff] }
  0x18   :  { %360 = vmatprep.subr.bf16.mxu1 %v359_v4  ;;  %v21_v35 = vld [vmem:[%s614_s1] sm:$0xff] }
  0x1a   :  { %330 = vmatpush3.bf16.msra.mxu0 %v329_v10 }
  0x1b   :  { %362 = vmatpush3.bf16.msra.mxu1 %v361_v13  ;;  %332 = vmatprep.subr.bf16.mxu0 %v331_v14 }
  0x1c   :  { %364 = vmatprep.subr.bf16.mxu1 %v363_v18 }
  0x1e   :  { %334 = vmatpush3.bf16.msra.mxu0 %v333_v24 }
  0x1f   :  { %366 = vmatpush3.bf16.msra.mxu1 %v365_v25  ;;  %336 = vmatprep.subr.bf16.mxu0 %v335_v26 }
  0x20   :  { %368 = vmatprep.subr.bf16.mxu1 %v367_v29 }
  0x22   :  { %338 = vmatpush3.bf16.msra.mxu0 %v337_v32 }
  0x23   :  { %370 = vmatpush3.bf16.msra.mxu1 %v369_v33 }
  0x25   :  { %154 = vmatmul.mubr.f32.vlgmr.msra.gmra.mrb[0].mxu0 %v55_v34 }
  0x26   :  { %224 = vmatmul.mubr.f32.vlgmr.msra.gmra.mrb[0].mxu1 %v21_v35 }
  0xf8   :  { %v269_v36 = vpop.f32.mrb[0].mxu0 }
  0xf9   :  { %v304_v37 = vpop.f32.mrb[0].mxu1  ;;  %v270_v38 = vpop.f32.mrb[1].mxu0 }
  0xfa   :  { %v271_v39 = vadd.f32 %v270_v38, %v269_v36  ;;  %v305_v40 = vpop.f32.mrb[1].mxu1 }
  0xfb   :  { %v306_v41 = vadd.f32 %v305_v40, %v304_v37 }
  0xfd   :  { %v226_v43 = vadd.f32 %v306_v41, %v271_v39 }
  0xff   :  { %v231_v44 = vadd.f32 %v230_v42, %v226_v43 }
 0x101   :  { %232 = vst [vmem:[%s616_s5] sm:$0xff] %v231_v44 }

</bundles_post_ra>
